<compile_context>
chip_gen: v5e
topology: v5e:2x2
jax: 0.10.0
libtpu: 0.0.40
codegen_flags: <defaults>
</compile_context>

<pallas_src>
import functools

import jax
import jax.numpy as jnp
from jax import lax
from jax.experimental import pallas as pl
from jax.experimental.pallas import tpu as pltpu


def _round_up(x, m):
    return ((x + m - 1) // m) * m


def _choose_tile(n, cap):
    """Row-block size: multiple of 8; MXU-friendly 128-multiples once blocking kicks in."""
    cap = max(8, (int(cap) // 8) * 8)
    n8 = max(8, _round_up(n, 8))
    if n8 <= cap:
        return n8                                   # single row block
    if cap >= 128:
        cands = list(range(128, cap + 1, 128))      # prefer 128/256/... tiles
    else:
        cands = [cap]
    # minimize padding; prefer the larger tile on ties
    return min(cands, key=lambda t: (_round_up(n, t), -t))


def _vmem_limit_bytes(n_pad, c, tile, stage_itemsize, in_itemsize, dot_itemsize):
    need = n_pad * c * stage_itemsize          # raw text staging (single-buffered)
    need += n_pad * c * dot_itemsize           # normalized text cache (matmul dtype)
    need += 2 * tile * c * in_itemsize         # double-buffered pc row block
    need += 8 * n_pad * 4                      # column accumulator (sublane padded)
    need += 4 * tile * n_pad * 4               # sim / exp temporaries (estimate)
    need += 2 << 20                            # headroom
    try:
        info = pltpu.get_tpu_info()
        cap = int(getattr(info, "vmem_capacity_bytes", 64 << 20))
    except Exception:
        cap = 64 << 20                         # conservative (v7x per-TC VMEM)
    return int(min(int(cap * 0.9), max(need, 32 << 20)))


def _ulip_kernel(scale_ref, pc_ref, tx_hbm, loss_ref, ulip_ref,
                 tx_stage, tx_dot, col_acc, scal, sem,
                 *, n_total, n_pad, tile, dot_dtype):
    i = pl.program_id(0)
    ni = pl.num_programs(0)
    # (F.normalize eps 1e-12)^2 : max(||x||, eps) == sqrt(max(||x||^2, eps^2))
    eps2 = 1e-24

    # ---- one-time setup: DMA full text HBM->VMEM once, normalize ONCE, cache ------
    @pl.when(i == 0)
    def _init():
        cp = pltpu.make_async_copy(tx_hbm, tx_stage, sem.at[0])
        cp.start()
        cp.wait()
        t = tx_stage[...].astype(jnp.float32)
        tn = t * lax.rsqrt(jnp.maximum(jnp.sum(t * t, axis=-1, keepdims=True), eps2))
        tx_dot[...] = tn.astype(dot_dtype)     # resident matmul operand (never re-DMA'd)
        col_acc[...] = jnp.zeros_like(col_acc)
        scal[0] = jnp.float32(0.0)             # sum(diag(sim))                (exact f32)
        scal[1] = jnp.float32(0.0)             # sum_rows log(sum_cols exp(sim-1))
        scal[2] = jnp.float32(0.0)             # sum_cols log(sum_rows exp(sim-1))

    # ---- normalize this pc row block once (rsqrt -> EUP slot) ----------------------
    pc = pc_ref[...].astype(jnp.float32)
    pc_n = pc * lax.rsqrt(jnp.maximum(jnp.sum(pc * pc, axis=-1, keepdims=True), eps2))

    # ---- exact f32 diagonal via row-wise dots (rows [i*T, i*T+T)) ------------------
    row0 = pl.multiple_of(i * tile, tile)
    tr = tx_stage[pl.ds(row0, tile), :].astype(jnp.float32)
    tr_n = tr * lax.rsqrt(jnp.maximum(jnp.sum(tr * tr, axis=-1, keepdims=True), eps2))
    scal[0] = scal[0] + jnp.sum(pc_n * tr_n)   # padded rows are exactly 0

    # ---- one (T, N_pad) sim strip on the MXU against the resident text ------------
    # contracting the last dims of both operands == q @ k.T (native MXU pattern,
    # no explicit transpose materialized)
    sim = lax.dot_general(pc_n.astype(dot_dtype), tx_dot[...],
                          (((1,), (1,)), ((), ())),
                          preferred_element_type=jnp.float32)

    # single-exp dual logsumexp: cosines <= 1 (bf16 rounding may nudge slightly
    # above 1, which is harmless), so a constant stabilizer of 1 is enough.
    p = jnp.exp(sim - 1.0)

    if n_pad > n_total:                        # trace-time branch: mask padded rows/cols
        col_valid = lax.broadcasted_iota(jnp.int32, (1, n_pad), 1) < n_total
        row_valid = (row0 + lax.broadcasted_iota(jnp.int32, (tile, 1), 0)) < n_total
        p = jnp.where(row_valid & col_valid, p, 0.0)
        rs = jnp.sum(p, axis=1, keepdims=True)
        rs = jnp.where(row_valid, rs, 1.0)     # log(1) == 0 for padded rows
    else:
        rs = jnp.sum(p, axis=1, keepdims=True)

    scal[1] = scal[1] + jnp.sum(jnp.log(rs))
    # TODO(synk): if a bundle dump shows XLU-bound after the data-residency fix,
    #             compute this column sum as ones(1,T) @ p on the MXU instead.
    col_acc[...] += jnp.sum(p, axis=0, keepdims=True)

    # ---- finalize on the last row block --------------------------------------------
    @pl.when(i == ni - 1)
    def _fin():
        cs = col_acc[...]
        if n_pad > n_total:
            col_valid = lax.broadcasted_iota(jnp.int32, (1, n_pad), 1) < n_total
            cs = jnp.where(col_valid, cs, 1.0)
        scal[2] = jnp.sum(jnp.log(cs))
        n_f = jnp.float32(n_total)
        mean_diag = scal[0] / n_f
        # mean(lse_rows) = scal[1]/N + 1 ; mean(lse_cols) = scal[2]/N + 1
        loss = 0.5 * ((scal[1] + scal[2]) / n_f + 2.0 - 2.0 * mean_diag)
        loss_ref[0] = loss
        s = scale_ref[0]
        ulip_ref[0] = s - s * mean_diag


def ulip_with_image_loss(outputs, *, tile_cap=512, matmul_dtype=None):
    pc = outputs['pc_embed']
    text = outputs['text_embed']
    # image_embed is normalized in the torch forward but contributes to no output.
    _ = outputs['image_embed']
    # self.labels (= rank*N + arange(N)) is module state unused by the returned losses.
    scale = jnp.reshape(jnp.asarray(outputs['logit_scale'], jnp.float32), (1,))

    N, C = pc.shape
    assert text.shape == (N, C)

    if matmul_dtype is None:
        # keep the input precision by default; pass jnp.bfloat16 explicitly for the
        # MXU-native path (~1e-3 sim error feeds the exp/log terms).
        matmul_dtype = jnp.bfloat16 if pc.dtype == jnp.bfloat16 else jnp.float32
    matmul_dtype = jnp.dtype(matmul_dtype)

    tile = _choose_tile(N, tile_cap)
    n_pad = _round_up(N, tile)
    nb = n_pad // tile
    if n_pad != N:
        pad = ((0, n_pad - N), (0, 0))
        pc = jnp.pad(pc, pad)
        text = jnp.pad(text, pad)

    kernel = functools.partial(_ulip_kernel, n_total=N, n_pad=n_pad, tile=tile,
                               dot_dtype=matmul_dtype)
    smem = pltpu.MemorySpace.SMEM
    vmem_limit = _vmem_limit_bytes(
        n_pad, C, tile,
        stage_itemsize=jnp.dtype(text.dtype).itemsize,
        in_itemsize=jnp.dtype(pc.dtype).itemsize,
        dot_itemsize=matmul_dtype.itemsize)

    loss, ulip = pl.pallas_call(
        kernel,
        out_shape=(jax.ShapeDtypeStruct((1,), jnp.float32),
                   jax.ShapeDtypeStruct((1,), jnp.float32)),
        grid=(nb,),
        in_specs=[pl.BlockSpec(memory_space=smem),                 # logit_scale (1,)
                  pl.BlockSpec((tile, C), lambda i: (i, 0)),       # pc row block
                  pl.BlockSpec(memory_space=pl.ANY)],              # text: HBM, DMA'd once
        out_specs=(pl.BlockSpec(memory_space=smem),
                   pl.BlockSpec(memory_space=smem)),
        scratch_shapes=[pltpu.VMEM((n_pad, C), text.dtype),        # raw text staging
                        pltpu.VMEM((n_pad, C), matmul_dtype),      # normalized text cache
                        pltpu.VMEM((1, n_pad), jnp.float32),       # column partial sums
                        pltpu.SMEM((3,), jnp.float32),             # scalar accumulators
                        pltpu.SemaphoreType.DMA((1,))],            # one-time text DMA
        compiler_params=pltpu.CompilerParams(
            # column/scalar accumulators carry across row blocks -> sequential axis
            dimension_semantics=("arbitrary",),
            vmem_limit_bytes=vmem_limit),
    )(scale, pc, text)

    loss = loss[0]
    return {'loss': loss,
            'ulip_loss': loss,
            'ulip_text_pc_sim': ulip[0],
            'ulip_text_image_sim': 0}


# ---------------------------- pure-JAX reference --------------------------------------
def _l2_normalize(x, eps=1e-12):
    n = jnp.sqrt(jnp.sum(x * x, axis=-1, keepdims=True))
    return x / jnp.maximum(n, eps)


def _reference(outputs):
    hp = jax.lax.Precision.HIGHEST
    pc = _l2_normalize(outputs['pc_embed'].astype(jnp.float32))
    tx = _l2_normalize(outputs['text_embed'].astype(jnp.float32))
    scale = jnp.asarray(outputs['logit_scale'], jnp.float32)
    logits = scale * jnp.matmul(pc, tx.T, precision=hp)
    ulip = scale - jnp.mean(jnp.diag(logits))
    # contrastive_loss re-normalizes (identity on unit-norm rows)
    e_s, e_t = _l2_normalize(pc), _l2_normalize(tx)
    sim = jnp.matmul(e_s, e_t.T, precision=hp)
    lp_s = jax.nn.log_softmax(sim, axis=1)
    lp_t = jax.nn.log_softmax(sim.T, axis=1)
    loss = 0.5 * (-jnp.mean(jnp.diag(lp_s)) - jnp.mean(jnp.diag(lp_t)))
    return loss, ulip


if __name__ == "__main__":
    key = jax.random.PRNGKey(0)
    k1, k2, k3 = jax.random.split(key, 3)

    # small shapes consistent with the module: batch N, embedding dim C
    N, C = 8, 32
    outputs = {
        'pc_embed': jax.random.normal(k1, (N, C), dtype=jnp.float32),
        'text_embed': jax.random.normal(k2, (N, C), dtype=jnp.float32),
        'image_embed': jax.random.normal(k3, (N, C), dtype=jnp.float32),
        # deterministic CLIP-style init: exp(log(1/0.07))
        'logit_scale': jnp.exp(jnp.float32(jnp.log(1.0 / 0.07))),
    }
    res = ulip_with_image_loss(outputs)
    jax.block_until_ready(res['loss'])
    ref_loss, ref_ulip = _reference(outputs)
    assert jnp.allclose(res['loss'], ref_loss, atol=2e-3, rtol=1e-3), (res['loss'], ref_loss)
    assert jnp.allclose(res['ulip_text_pc_sim'], ref_ulip, atol=2e-3, rtol=1e-3)

    # multi row-block + padding path: N=20 pads to 24 with tile 8 (masked rows/cols)
    N2, C2 = 20, 128
    k4, k5, k6 = jax.random.split(jax.random.PRNGKey(1), 3)
    outputs2 = {
        'pc_embed': jax.random.normal(k4, (N2, C2), dtype=jnp.float32),
        'text_embed': jax.random.normal(k5, (N2, C2), dtype=jnp.float32),
        'image_embed': jax.random.normal(k6, (N2, C2), dtype=jnp.float32),
        'logit_scale': jnp.float32(1.0 / 0.07),
    }
    res2 = ulip_with_image_loss(outputs2, tile_cap=8)
    jax.block_until_ready(res2['loss'])
    ref_loss2, ref_ulip2 = _reference(outputs2)
    assert jnp.allclose(res2['loss'], ref_loss2, atol=2e-3, rtol=1e-3), (res2['loss'], ref_loss2)
    assert jnp.allclose(res2['ulip_text_pc_sim'], ref_ulip2, atol=2e-3, rtol=1e-3)

    # bf16 MXU path for the sim matmul (diag stays f32); looser tolerance
    res3 = ulip_with_image_loss(outputs2, tile_cap=16, matmul_dtype=jnp.bfloat16)
    jax.block_until_ready(res3['loss'])
    assert jnp.allclose(res3['loss'], ref_loss2, atol=2e-2, rtol=1e-2), (res3['loss'], ref_loss2)
    assert jnp.allclose(res3['ulip_text_pc_sim'], ref_ulip2, atol=2e-2, rtol=1e-2)

    print("KERNEL_OK")
</pallas_src>

<mosaic_0001>
module attributes {stable_mosaic.version = 11 : i64} {
  func.func @_ulip_kernel(%arg0: i32, %arg1: memref<1xf32, #tpu.memory_space<smem>>, %arg2: memref<8x32xf32, #tpu.memory_space<vmem>>, %arg3: memref<8x32xf32, #tpu.memory_space<any>>, %arg4: memref<1xf32, #tpu.memory_space<smem>>, %arg5: memref<1xf32, #tpu.memory_space<smem>>, %arg6: memref<8x32xf32, #tpu.memory_space<vmem>>, %arg7: memref<8x32xf32, #tpu.memory_space<vmem>>, %arg8: memref<1x8xf32, #tpu.memory_space<vmem>>, %arg9: memref<3xf32, #tpu.memory_space<smem>>, %arg10: memref<1x!tpu.dma_semaphore, #tpu.memory_space<semaphore_mem>>) attributes {dimension_semantics = [#tpu.dimension_semantics<arbitrary>], iteration_bounds = array<i64: 1>, scalar_prefetch = 0 : i64, scratch_operands = 5 : i64, tpu.core_type = #tpu.core_type<tc>, window_params = [{transform_indices = @transform_0, window_bounds = array<i64: 1>}, {transform_indices = @transform_1, window_bounds = array<i64: 8, 32>}, {}, {transform_indices = @transform_3, window_bounds = array<i64: 1>}, {transform_indices = @transform_4, window_bounds = array<i64: 1>}]} {
    %c0_i32 = arith.constant 0 : i32
    %0 = arith.cmpi eq, %arg0, %c0_i32 : i32
    %1 = arith.extui %0 : i1 to i32
    %c0_i32_0 = arith.constant 0 : i32
    %2 = arith.cmpi ne, %1, %c0_i32_0 : i32
    scf.if %2 {
      %c0_i32_23 = arith.constant 0 : i32
      %55 = tpu.memref_slice %arg10[%c0_i32_23] : memref<1x!tpu.dma_semaphore, #tpu.memory_space<semaphore_mem>> -> memref<1x!tpu.dma_semaphore, #tpu.memory_space<semaphore_mem>>
      %56 = tpu.memref_squeeze %55 : memref<1x!tpu.dma_semaphore, #tpu.memory_space<semaphore_mem>> -> memref<!tpu.dma_semaphore, #tpu.memory_space<semaphore_mem>>
      tpu.enqueue_dma source(%arg3 : memref<8x32xf32, #tpu.memory_space<any>>) target(%arg6 : memref<8x32xf32, #tpu.memory_space<vmem>>) target_semaphore(%56 : memref<!tpu.dma_semaphore, #tpu.memory_space<semaphore_mem>>)
      %c0_i32_24 = arith.constant 0 : i32
      %57 = tpu.memref_slice %arg10[%c0_i32_24] : memref<1x!tpu.dma_semaphore, #tpu.memory_space<semaphore_mem>> -> memref<1x!tpu.dma_semaphore, #tpu.memory_space<semaphore_mem>>
      %58 = tpu.memref_squeeze %57 : memref<1x!tpu.dma_semaphore, #tpu.memory_space<semaphore_mem>> -> memref<!tpu.dma_semaphore, #tpu.memory_space<semaphore_mem>>
      tpu.wait_dma2 semaphore(%58 : memref<!tpu.dma_semaphore, #tpu.memory_space<semaphore_mem>>) src(%arg3 : memref<8x32xf32, #tpu.memory_space<any>>) dst(%arg6 : memref<8x32xf32, #tpu.memory_space<vmem>>)
      %c0_25 = arith.constant 0 : index
      %c0_26 = arith.constant 0 : index
      %59 = vector.load %arg6[%c0_25, %c0_26] : memref<8x32xf32, #tpu.memory_space<vmem>>, vector<8x32xf32>
      %60 = arith.mulf %59, %59 : vector<8x32xf32>
      %cst_27 = arith.constant dense<0.000000e+00> : vector<8xf32>
      %61 = vector.multi_reduction <add>, %60, %cst_27 [1] : vector<8x32xf32> to vector<8xf32>
      %62 = vector.shape_cast %61 : vector<8xf32> to vector<8x1xf32>
      %cst_28 = arith.constant 1.000000e-24 : f32
      %63 = vector.broadcast %cst_28 : f32 to vector<8x1xf32>
      %64 = arith.maximumf %62, %63 : vector<8x1xf32>
      %65 = math.rsqrt %64 : vector<8x1xf32>
      %66 = vector.broadcast %65 : vector<8x1xf32> to vector<8x32xf32>
      %67 = arith.mulf %59, %66 : vector<8x32xf32>
      %c0_29 = arith.constant 0 : index
      %c0_30 = arith.constant 0 : index
      %68 = vector.load %arg7[%c0_29, %c0_30] : memref<8x32xf32, #tpu.memory_space<vmem>>, vector<8x32xf32>
      tpu.vector_store %arg7[%c0_29, %c0_30], %67 {strides = array<i32>} : memref<8x32xf32, #tpu.memory_space<vmem>>, vector<8x32xf32>,
      %cst_31 = arith.constant 0.000000e+00 : f32
      %69 = vector.broadcast %cst_31 : f32 to vector<1x8xf32>
      %c0_32 = arith.constant 0 : index
      %c0_33 = arith.constant 0 : index
      %70 = vector.load %arg8[%c0_32, %c0_33] : memref<1x8xf32, #tpu.memory_space<vmem>>, vector<1x8xf32>
      tpu.vector_store %arg8[%c0_32, %c0_33], %69 {strides = array<i32>} : memref<1x8xf32, #tpu.memory_space<vmem>>, vector<1x8xf32>,
      %cst_34 = arith.constant 0.000000e+00 : f32
      %c0_35 = arith.constant 0 : index
      %71 = memref.load %arg9[%c0_35] : memref<3xf32, #tpu.memory_space<smem>>
      memref.store %cst_34, %arg9[%c0_35] : memref<3xf32, #tpu.memory_space<smem>>
      %cst_36 = arith.constant 0.000000e+00 : f32
      %c1_37 = arith.constant 1 : index
      %72 = memref.load %arg9[%c1_37] : memref<3xf32, #tpu.memory_space<smem>>
      memref.store %cst_36, %arg9[%c1_37] : memref<3xf32, #tpu.memory_space<smem>>
      %cst_38 = arith.constant 0.000000e+00 : f32
      %c2 = arith.constant 2 : index
      %73 = memref.load %arg9[%c2] : memref<3xf32, #tpu.memory_space<smem>>
      memref.store %cst_38, %arg9[%c2] : memref<3xf32, #tpu.memory_space<smem>>
    } else {
    }
    %c0 = arith.constant 0 : index
    %c0_1 = arith.constant 0 : index
    %3 = vector.load %arg2[%c0, %c0_1] : memref<8x32xf32, #tpu.memory_space<vmem>>, vector<8x32xf32>
    %4 = arith.mulf %3, %3 : vector<8x32xf32>
    %cst = arith.constant dense<0.000000e+00> : vector<8xf32>
    %5 = vector.multi_reduction <add>, %4, %cst [1] : vector<8x32xf32> to vector<8xf32>
    %6 = vector.shape_cast %5 : vector<8xf32> to vector<8x1xf32>
    %cst_2 = arith.constant 1.000000e-24 : f32
    %7 = vector.broadcast %cst_2 : f32 to vector<8x1xf32>
    %8 = arith.maximumf %6, %7 : vector<8x1xf32>
    %9 = math.rsqrt %8 : vector<8x1xf32>
    %10 = vector.broadcast %9 : vector<8x1xf32> to vector<8x32xf32>
    %11 = arith.mulf %3, %10 : vector<8x32xf32>
    %c8_i32 = arith.constant 8 : i32
    %12 = arith.muli %arg0, %c8_i32 : i32
    %13 = tpu.assume_multiple %12, 8 : i32
    %14 = arith.index_cast %13 : i32 to index
    %c0_3 = arith.constant 0 : index
    %15 = vector.load %arg6[%14, %c0_3] : memref<8x32xf32, #tpu.memory_space<vmem>>, vector<8x32xf32>
    %16 = arith.mulf %15, %15 : vector<8x32xf32>
    %cst_4 = arith.constant dense<0.000000e+00> : vector<8xf32>
    %17 = vector.multi_reduction <add>, %16, %cst_4 [1] : vector<8x32xf32> to vector<8xf32>
    %18 = vector.shape_cast %17 : vector<8xf32> to vector<8x1xf32>
    %cst_5 = arith.constant 1.000000e-24 : f32
    %19 = vector.broadcast %cst_5 : f32 to vector<8x1xf32>
    %20 = arith.maximumf %18, %19 : vector<8x1xf32>
    %21 = math.rsqrt %20 : vector<8x1xf32>
    %22 = vector.broadcast %21 : vector<8x1xf32> to vector<8x32xf32>
    %23 = arith.mulf %15, %22 : vector<8x32xf32>
    %c0_6 = arith.constant 0 : index
    %24 = memref.load %arg9[%c0_6] : memref<3xf32, #tpu.memory_space<smem>>
    %25 = arith.mulf %11, %23 : vector<8x32xf32>
    %26 = vector.shape_cast %25 : vector<8x32xf32> to vector<1x8x32xf32>
    %cst_7 = arith.constant dense<0.000000e+00> : vector<1xf32>
    %27 = vector.multi_reduction <add>, %26, %cst_7 [1, 2] : vector<1x8x32xf32> to vector<1xf32>
    %28 = vector.shape_cast %27 : vector<1xf32> to vector<1x1x1xf32>
    %29 = vector.extract %28[0, 0, 0] : f32 from vector<1x1x1xf32>
    %30 = arith.addf %24, %29 : f32
    %c0_8 = arith.constant 0 : index
    %31 = memref.load %arg9[%c0_8] : memref<3xf32, #tpu.memory_space<smem>>
    memref.store %30, %arg9[%c0_8] : memref<3xf32, #tpu.memory_space<smem>>
    %c0_9 = arith.constant 0 : index
    %c0_10 = arith.constant 0 : index
    %32 = vector.load %arg7[%c0_9, %c0_10] : memref<8x32xf32, #tpu.memory_space<vmem>>, vector<8x32xf32>
    %cst_11 = arith.constant dense<0.000000e+00> : vector<8x8xf32>
    %33 = tpu.matmul %11, %32, %cst_11 {dimension_numbers = #tpu.dot_dimension_numbers<[1], [1], [0], [0], [0, 0, 1, 0], [], []>} : vector<8x32xf32>, vector<8x32xf32>, vector<8x8xf32> -> vector<8x8xf32>
    %cst_12 = arith.constant 1.000000e+00 : f32
    %34 = vector.broadcast %cst_12 : f32 to vector<8x8xf32>
    %35 = arith.subf %33, %34 : vector<8x8xf32>
    %36 = math.exp %35 : vector<8x8xf32>
    %cst_13 = arith.constant dense<0.000000e+00> : vector<8xf32>
    %37 = vector.multi_reduction <add>, %36, %cst_13 [1] : vector<8x8xf32> to vector<8xf32>
    %38 = vector.shape_cast %37 : vector<8xf32> to vector<8x1xf32>
    %c1 = arith.constant 1 : index
    %39 = memref.load %arg9[%c1] : memref<3xf32, #tpu.memory_space<smem>>
    %40 = math.log %38 : vector<8x1xf32>
    %41 = vector.shape_cast %40 : vector<8x1xf32> to vector<1x8x1xf32>
    %cst_14 = arith.constant dense<0.000000e+00> : vector<1xf32>
    %42 = vector.multi_reduction <add>, %41, %cst_14 [1, 2] : vector<1x8x1xf32> to vector<1xf32>
    %43 = vector.shape_cast %42 : vector<1xf32> to vector<1x1x1xf32>
    %44 = vector.extract %43[0, 0, 0] : f32 from vector<1x1x1xf32>
    %45 = arith.addf %39, %44 : f32
    %c1_15 = arith.constant 1 : index
    %46 = memref.load %arg9[%c1_15] : memref<3xf32, #tpu.memory_space<smem>>
    memref.store %45, %arg9[%c1_15] : memref<3xf32, #tpu.memory_space<smem>>
    %c0_16 = arith.constant 0 : index
    %c0_17 = arith.constant 0 : index
    %47 = vector.load %arg8[%c0_16, %c0_17] : memref<1x8xf32, #tpu.memory_space<vmem>>, vector<1x8xf32>
    %cst_18 = arith.constant dense<0.000000e+00> : vector<8xf32>
    %48 = vector.multi_reduction <add>, %36, %cst_18 [0] : vector<8x8xf32> to vector<8xf32>
    %49 = vector.shape_cast %48 : vector<8xf32> to vector<1x8xf32>
    %50 = arith.addf %47, %49 : vector<1x8xf32>
    %c0_19 = arith.constant 0 : index
    %c0_20 = arith.constant 0 : index
    %51 = vector.load %arg8[%c0_19, %c0_20] : memref<1x8xf32, #tpu.memory_space<vmem>>, vector<1x8xf32>
    tpu.vector_store %arg8[%c0_19, %c0_20], %50 {strides = array<i32>} : memref<1x8xf32, #tpu.memory_space<vmem>>, vector<1x8xf32>,
    %c0_i32_21 = arith.constant 0 : i32
    %52 = arith.cmpi eq, %arg0, %c0_i32_21 : i32
    %53 = arith.extui %52 : i1 to i32
    %c0_i32_22 = arith.constant 0 : i32
    %54 = arith.cmpi ne, %53, %c0_i32_22 : i32
    scf.if %54 {
      %c0_23 = arith.constant 0 : index
      %c0_24 = arith.constant 0 : index
      %55 = vector.load %arg8[%c0_23, %c0_24] : memref<1x8xf32, #tpu.memory_space<vmem>>, vector<1x8xf32>
      %56 = math.log %55 : vector<1x8xf32>
      %57 = vector.shape_cast %56 : vector<1x8xf32> to vector<1x1x8xf32>
      %cst_25 = arith.constant dense<0.000000e+00> : vector<1xf32>
      %58 = vector.multi_reduction <add>, %57, %cst_25 [1, 2] : vector<1x1x8xf32> to vector<1xf32>
      %59 = vector.shape_cast %58 : vector<1xf32> to vector<1x1x1xf32>
      %60 = vector.extract %59[0, 0, 0] : f32 from vector<1x1x1xf32>
      %c2 = arith.constant 2 : index
      %61 = memref.load %arg9[%c2] : memref<3xf32, #tpu.memory_space<smem>>
      memref.store %60, %arg9[%c2] : memref<3xf32, #tpu.memory_space<smem>>
      %c0_26 = arith.constant 0 : index
      %62 = memref.load %arg9[%c0_26] : memref<3xf32, #tpu.memory_space<smem>>
      %cst_27 = arith.constant 8.000000e+00 : f32
      %63 = arith.divf %62, %cst_27 : f32
      %c1_28 = arith.constant 1 : index
      %64 = memref.load %arg9[%c1_28] : memref<3xf32, #tpu.memory_space<smem>>
      %c2_29 = arith.constant 2 : index
      %65 = memref.load %arg9[%c2_29] : memref<3xf32, #tpu.memory_space<smem>>
      %66 = arith.addf %64, %65 : f32
      %cst_30 = arith.constant 8.000000e+00 : f32
      %67 = arith.divf %66, %cst_30 : f32
      %cst_31 = arith.constant 2.000000e+00 : f32
      %68 = arith.addf %67, %cst_31 : f32
      %cst_32 = arith.constant 2.000000e+00 : f32
      %69 = arith.mulf %cst_32, %63 : f32
      %70 = arith.subf %68, %69 : f32
      %cst_33 = arith.constant 5.000000e-01 : f32
      %71 = arith.mulf %cst_33, %70 : f32
      %c0_34 = arith.constant 0 : index
      %72 = memref.load %arg4[%c0_34] : memref<1xf32, #tpu.memory_space<smem>>
      memref.store %71, %arg4[%c0_34] : memref<1xf32, #tpu.memory_space<smem>>
      %c0_35 = arith.constant 0 : index
      %73 = memref.load %arg1[%c0_35] : memref<1xf32, #tpu.memory_space<smem>>
      %74 = arith.mulf %73, %63 : f32
      %75 = arith.subf %73, %74 : f32
      %c0_36 = arith.constant 0 : index
      %76 = memref.load %arg5[%c0_36] : memref<1xf32, #tpu.memory_space<smem>>
      memref.store %75, %arg5[%c0_36] : memref<1xf32, #tpu.memory_space<smem>>
    } else {
    }
    return
  }
  func.func @transform_0(%arg0: i32) -> i32 {
    %c0_i32 = arith.constant 0 : i32
    %c0_i32_0 = arith.constant 0 : i32
    return %c0_i32 : i32
  }
  func.func @transform_1(%arg0: i32) -> (i32, i32) {
    %c0_i32 = arith.constant 0 : i32
    %c0_i32_0 = arith.constant 0 : i32
    return %arg0, %c0_i32 : i32, i32
  }
  func.func @transform_3(%arg0: i32) -> i32 {
    %c0_i32 = arith.constant 0 : i32
    %c0_i32_0 = arith.constant 0 : i32
    return %c0_i32 : i32
  }
  func.func @transform_4(%arg0: i32) -> i32 {
    %c0_i32 = arith.constant 0 : i32
    %c0_i32_0 = arith.constant 0 : i32
    return %c0_i32 : i32
  }
}

</mosaic_0001>

<bundles_post_ra>
// kernel: tpu_custom_call.1
= control target key start
LH: loop header
LB: loop body
LE: loop exit
PB: predicated region body
PF: predicated region fallthrough
CT: control target
= control target key end

     0   :  { %11 = vsyncpa [#allocation9], 0  ;;  %s451_s0 = inlined_call_operand.<no memory space> [shape: f32[1], index: 0, kind: input, shape index: {}]   ;;  %s452_s1 = inlined_call_operand.hbm [shape: f32[8,32], index: 1, kind: input, shape index: {}]   ;;  %s453_s2 = inlined_call_operand.hbm [shape: f32[8,32], index: 2, kind: input, shape index: {}]   ;;  %s454_s3 = inlined_call_operand.hbm [shape: f32[1], index: 3, kind: output, shape index: {0}]   ;;  %s455_s4 = inlined_call_operand.hbm [shape: f32[1], index: 4, kind: output, shape index: {1}]  }
   0x1   :  { %12 = vsyncpa [#allocation10], 0 }
   0x2   :  { %13 = vsyncpa [#allocation13], 0  ;;  %s21_s17 = sshll.u32 %s452_s1, 4  ;;  %s393_s18 = smov [#allocation8]   ;;  %s22_s17 = int_to_ptr.hbm [resolvable:$true] %s21_s17 }
   0x3   :  { %s23_s19 = sshll.u32 %s393_s18, 4  ;;  %s24_s19 = int_to_ptr.vmem [resolvable:$true] %s23_s19 }
   0x4   :  { %26 = dma.hbm_to_vmem [thread:$0]  %s22_s17, 128, %s24_s19, [#allocation9]  }
   0x5   :  { %385 = dma.done.wait [#allocation9], 128  }
   0x6   :  { %386 = vsyncadd [#allocation9], 4294967168  ;;  %s42_s22 = sshll.u32 %s453_s2, 4  ;;  %s394_s23 = smov [#allocation2]   ;;  %s43_s22 = int_to_ptr.hbm [resolvable:$true] %s42_s22 }
   0x7   :  { %s44_s24 = sshll.u32 %s394_s23, 4  ;;  %s45_s24 = int_to_ptr.vmem [resolvable:$true] %s44_s24 }
   0x8   :  { %47 = dma.hbm_to_vmem [thread:$0]  %s43_s22, 128, %s45_s24, [#allocation6] }
   0x9   :  { %387 = dma.done.wait [#allocation6], 128 }
   0xa   :  { %388 = vsyncadd [#allocation6], 4294967168  ;;  %v51_v0 = vld [vmem:[#allocation2] sm:$0xff]  ;;  %vm53_vm0 = vcmask 261120   ;;  %v78_v2 = vld [vmem:[#allocation8] sm:$0xff]  ;;  %vm70_vm10 = vcmask 57344  }
   0xb   :  { %v52_v1 = vmul.f32 %v51_v0, %v51_v0  ;;  %v79_v4 = vmul.f32 %v78_v2, %v78_v2  ;;  %v395_v39 = vmov 0.0   ;;  %vm160_vm11 = vcmask 64512   ;;  %s247_s7 = sshll.u32 %s454_s3, 4  ;;  %s256_s14 = sshll.u32 %s455_s4, 4  ;;  %s248_s7 = int_to_ptr.hbm [resolvable:$true] %s247_s7  ;;  %s257_s14 = int_to_ptr.hbm [resolvable:$true] %s256_s14 }
   0xc   :  { %71 = vst.msk [vmem:[#allocation4] sm:$0x1] %vm70_vm10, %v395_v39  ;;  %vm167_vm12 = vcmask 7168   ;;  %s397_s3 = smov [#allocation11]   ;;  %s398_s20 = smov [#allocation12]  }
   0xd   :  { %v54_v3 = vsel %vm53_vm0, %v52_v1, 0.0  ;;  %v81_v5 = vsel %vm53_vm0, %v79_v4, 0.0  ;;  %v396_v4 = vmov 8.0  }
   0xe   :  { %55 = vadd.xlane.f32.xlu0 %v54_v3  ;;  %101 = vadd.xlane.f32.xlu1 %v54_v3 }
  0x13   :  { %v181_v57 = vld [vmem:[#allocation4] sm:$0x1] }
  0x16   :  { %82 = vadd.xlane.f32.xlu0 %v81_v5 }
  0x81   :  { %v56_v6 = vpop.xlane.xlu0 %55  ;;  %v102_v7 = vpop.xlane.xlu1 %101 }
  0x82   :  { %v57_v8 = vmax.f32 %v56_v6, 1e-24  ;;  %v103_v9 = vmax.f32 %v102_v7, 1e-24 }
  0x84   :  { %299 = vrsqrt.f32 %v57_v8  ;;  %vm64_vm2 = vweird.f32 %v57_v8  ;;  %vm110_vm3 = vweird.f32 %v103_v9 }
  0x85   :  { %301 = vrsqrt.f32 %v103_v9 }
  0x89   :  { %v83_v10 = vpop.xlane.xlu0 %82 }
  0x8a   :  { %v300_v11 = vpop.eup %299  ;;  %v84_v12 = vmax.f32 %v83_v10, 1e-24 }
  0x8b   :  { %v302_v13 = vpop.eup %301  ;;  %v59_v14 = vmul.f32 %v300_v11, %v57_v8  ;;  %vm65_vm1 = vweird.f32 %v300_v11 }
  0x8c   :  { %v105_v15 = vmul.f32 %v302_v13, %v103_v9  ;;  %303 = vrsqrt.f32 %v84_v12  ;;  %vm111_vm4 = vweird.f32 %v302_v13  ;;  %vm66_vm5 = vmor %vm64_vm2, %vm65_vm1  ;;  %vm91_vm8 = vweird.f32 %v84_v12 }
  0x8d   :  { %v60_v16 = vmul.f32 %v300_v11, %v59_v14  ;;  %vm112_vm6 = vmor %vm110_vm3, %vm111_vm4 }
  0x8e   :  { %v106_v17 = vmul.f32 %v302_v13, %v105_v15 }
  0x8f   :  { %v61_v18 = vmul.f32 0.5, %v60_v16 }
  0x90   :  { %v107_v19 = vmul.f32 0.5, %v106_v17 }
  0x91   :  { %v62_v20 = vsub.f32 1.5, %v61_v18 }
  0x92   :  { %v304_v21 = vpop.eup %303  ;;  %v108_v22 = vsub.f32 1.5, %v107_v19 }
  0x93   :  { %v63_v23 = vmul.f32 %v300_v11, %v62_v20  ;;  %v86_v24 = vmul.f32 %v304_v21, %v84_v12  ;;  %vm92_vm7 = vweird.f32 %v304_v21 }
  0x94   :  { %v109_v27 = vmul.f32 %v302_v13, %v108_v22  ;;  %vm93_vm9 = vmor %vm91_vm8, %vm92_vm7 }
  0x95   :  { %v67_v25 = vsel %vm66_vm5, %v300_v11, %v63_v23  ;;  %v87_v26 = vmul.f32 %v304_v21, %v86_v24 }
  0x96   :  { %v68_v28 = vmul.f32 %v67_v25, %v51_v0  ;;  %v113_v31 = vsel %vm112_vm6, %v302_v13, %v109_v27 }
  0x97   :  { %v88_v29 = vmul.f32 0.5, %v87_v26  ;;  %v114_v33 = vmul.f32 %v113_v31, %v51_v0 }
  0x98   :  { %69 = vst.msk [vmem:[#allocation3] sm:$0xff] %vm53_vm0, %v68_v28 }
  0x99   :  { %v89_v30 = vsub.f32 1.5, %v88_v29 }
  0x9b   :  { %v90_v32 = vmul.f32 %v304_v21, %v89_v30 }
  0x9d   :  { %v94_v34 = vsel %vm93_vm9, %v304_v21, %v90_v32 }
  0x9e   :  { %v95_v35 = vmul.f32 %v94_v34, %v78_v2 }
  0x9f   :  { %v130_v36 = vld [vmem:[#allocation3] sm:$0xff] }
  0xa0   :  { %278 = vmatpush.xpose.msk.msra.mxu0 %vm53_vm0, %v130_v36  ;;  %v116_v37 = vmul.f32 %v114_v33, %v95_v35 }
  0xa2   :  { %v117_v38 = vsel %vm53_vm0, %v116_v37, 0.0 }
  0xa3   :  { %279 = vmatmul.msk.f32.vlgmr.msra.gmra.mxu0 %vm53_vm0, %v95_v35  ;;  %118 = vadd.xlane.f32.xlu2 %v117_v38 }
 0x116   :  { %v119_v40 = vpop.xlane.xlu2 %118 }
 0x117   :  { %v120_v41 = vrot.slane %v119_v40, 4 }
 0x119   :  { %v121_v42 = vadd.f32 %v120_v41, %v119_v40 }
 0x11b   :  { %v122_v43 = vrot.slane %v121_v42, 2 }
 0x11d   :  { %v123_v44 = vadd.f32 %v122_v43, %v121_v42 }
 0x11f   :  { %v124_v45 = vrot.slane %v123_v44, 1 }
 0x120   :  { %v154_v46 = vpop.f32.mrf.mxu0 }
 0x121   :  { %v280_v47 = vadd.f32 -1.0, %v154_v46  ;;  %v125_v48 = vadd.f32 %v124_v45, %v123_v44 }
 0x123   :  { %v158_v49 = vmul.f32 1.442695, %v280_v47  ;;  %285 = vpush %v125_v48 }
 0x125   :  { %305 = vpow2.f32 %v158_v49 }
 0x12b   :  { %v306_v50 = vpop.eup %305 }
 0x12c   :  { %v161_v51 = vsel %vm160_vm11, %v306_v50, 0.0 }
 0x12d   :  { %162 = vadd.xlane.f32.xlu1 %v161_v51  ;;  %v182_v52 = vrot.slane %v161_v51, 4 }
 0x12f   :  { %v183_v53 = vadd.f32 %v182_v52, %v161_v51 }
 0x131   :  { %v184_v54 = vrot.slane %v183_v53, 2 }
 0x133   :  { %v185_v55 = vadd.f32 %v184_v54, %v183_v53 }
 0x135   :  { %v186_v56 = vrot.slane %v185_v55, 1 }
 0x137   :  { %v187_v58 = vadd.f32 %v186_v56, %v185_v55 }
 0x139   :  { %v188_v59 = vadd.f32 %v187_v58, %v181_v57 }
 0x13b   :  { %190 = vst.msk [vmem:[#allocation4] sm:$0x1] %vm70_vm10, %v188_v59 }
 0x142   :  { %v194_v60 = vld [vmem:[#allocation4] sm:$0x1] }
 0x143   :  { %307 = vlog2.f32 %v194_v60 }
 0x149   :  { %v308_v61 = vpop.eup %307 }
 0x14a   :  { %v196_v62 = vmul.f32 0.6931472, %v308_v61 }
 0x14c   :  { %v197_v63 = vsel %vm70_vm10, %v196_v62, 0.0 }
 0x14d   :  { %198 = vadd.xlane.f32.xlu0 %v197_v63 }
 0x154   :  { %s286_s1 = spop %285 }
 0x1a0   :  { %v163_v0 = vpop.xlane.xlu1 %162 }
 0x1a1   :  { %309 = vlog2.f32 %v163_v0 }
 0x1a2   :  { %311 = vrcp.f32 %v396_v4 }
 0x1a7   :  { %v310_v1 = vpop.eup %309 }
 0x1a8   :  { %v166_v2 = vmul.f32 0.6931472, %v310_v1  ;;  %v312_v7 = vpop.eup %311 }
 0x1a9   :  { %v211_v9 = vmul.f32 8.0, %v312_v7  ;;  %vm215_vm13 = vweird.f32 %v312_v7 }
 0x1aa   :  { %v168_v3 = vsel %vm167_vm12, %v166_v2, 0.0 }
 0x1ab   :  { %169 = vadd.xlane.f32.xlu2 %v168_v3  ;;  %v212_v12 = vsub.f32 1.0, %v211_v9 }
 0x1ad   :  { %v213_v16 = vmul.f32 %v312_v7, %v212_v12 }
 0x1af   :  { %v214_v20 = vadd.f32 %v312_v7, %v213_v16 }
 0x1b1   :  { %v216_v24 = vsel %vm215_vm13, %v312_v7, %v214_v20 }
 0x1c0   :  { %v199_v5 = vpop.xlane.xlu0 %198 }
 0x1c1   :  { %v200_v6 = vrot.slane %v199_v5, 4 }
 0x1c3   :  { %v201_v8 = vadd.f32 %v200_v6, %v199_v5 }
 0x1c5   :  { %v202_v10 = vrot.slane %v201_v8, 2 }
 0x1c7   :  { %v203_v15 = vadd.f32 %v202_v10, %v201_v8 }
 0x1c9   :  { %v204_v19 = vrot.slane %v203_v15, 1 }
 0x1cb   :  { %v205_v23 = vadd.f32 %v204_v19, %v203_v15 }
 0x21e   :  { %v170_v11 = vpop.xlane.xlu2 %169 }
 0x21f   :  { %v171_v13 = vrot.slane %v170_v11, 4 }
 0x221   :  { %v172_v14 = vadd.f32 %v171_v13, %v170_v11 }
 0x223   :  { %v173_v17 = vrot.slane %v172_v14, 2 }
 0x225   :  { %v174_v18 = vadd.f32 %v173_v17, %v172_v14 }
 0x227   :  { %v175_v21 = vrot.slane %v174_v18, 1 }
 0x229   :  { %v176_v22 = vadd.f32 %v175_v21, %v174_v18 }
 0x22b   :  { %287 = vpush %v176_v22 }
 0x22c   :  { %289 = vpush %v205_v23 }
 0x22d   :  { %291 = vpush %v216_v24 }
 0x25c   :  { %s288_s2 = spop %287 }
 0x25d   :  { %s290_s25 = spop %289 }
 0x25e   :  { %s221_s26 = sadd.f32 %s290_s25, %s288_s2  ;;  %s292_s27 = spop %291 }
 0x25f   :  { %s218_s28 = smul.f32 %s292_s27, %s286_s1 }
 0x260   :  { %s230_s29 = smul.f32 %s292_s27, %s221_s26 }
 0x261   :  { %s232_s30 = smul.f32 2.0, %s218_s28 }
 0x262   :  { %s231_s8 = sadd.f32 2.0, %s230_s29  ;;  %s238_s11 = smul.f32 %s218_s28, %s451_s0 }
 0x264   :  { %s233_s15 = ssub.f32 %s231_s8, %s232_s30 }
 0x265   :  { %s239_s18 = ssub.f32 %s451_s0, %s238_s11 }
 0x266   :  { %s234_s19 = smul.f32 0.5, %s233_s15 }
 0x267   :  { %241 = sst [smem:[#allocation12]] %s239_s18 }
 0x268   :  { %236 = sst [smem:[#allocation11]] %s234_s19 }
 0x269   :  { %250 = dma.smem_to_hbm %s397_s3, 16, %s248_s7, [#allocation10]  }
 0x26a   :  { %259 = dma.smem_to_hbm %s398_s20, 16, %s257_s14, [#allocation13]  }
 0x26b   :  { %389 = dma.done.wait [#allocation10], 16  }
 0x26c   :  { %390 = vsyncadd [#allocation10], 4294967280 }
 0x26d   :  { %391 = dma.done.wait [#allocation13], 16  }
 0x26e   :  { %392 = vsyncadd [#allocation13], 4294967280 }
 0x26f   :  { %268 = sfence }
 0x270   :  { %269 = vsyncpa [#allocation9], 1 }
 0x271   :  { %270 = vsyncpa [#allocation10], 1 }
 0x272   :  { %271 = vsyncpa [#allocation13], 1 }
 0x273   :  { %272 = vsyncmov [#allocation6] }
 0x276   :  { %s273_s4 = vpop.sfrf %272 }
 0x277   :  { %p284_p0 = scmp.ne.s32.totalorder %s273_s4, 0 }
 0x279   :  { %277 = shalt.err (%p284_p0)  }

</bundles_post_ra>
